<compile_context>
chip_gen: v7x
topology: tpu7x:2x2x1
jax: 0.10.0
libtpu: 0.0.40
codegen_flags: <defaults>
</compile_context>

<pallas_src>
import numpy as np

import jax
import jax.numpy as jnp
from jax.experimental import pallas as pl
from jax.experimental.pallas import tpu as pltpu


def _critic_kernel(s_ref, a_ref, w1s_ref, w1a_ref, w2_ref, w3_ref, o_ref):
    # Layer 1 (fused concat, transposed): (H1,S)@(S,tb) + (H1,A)@(A,tb).
    # Inputs/weights arrive already in the compute dtype; f32 accumulation.
    h1 = (jnp.dot(w1s_ref[...], s_ref[...], preferred_element_type=jnp.float32)
          + jnp.dot(w1a_ref[...], a_ref[...], preferred_element_type=jnp.float32))
    h1 = jnp.maximum(h1, 0.0)                       # ReLU in f32, lane-dense

    # Layer 2: (H2,H1)@(H1,tb) -> (H2,tb), f32 accumulation.
    h2 = jnp.dot(w2_ref[...], h1.astype(w2_ref.dtype),
                 preferred_element_type=jnp.float32)
    h2 = jnp.maximum(h2, 0.0)                       # ReLU in f32

    # Layer 3 (out_features == 1): VPU multiply + sublane (XLU) reduce.
    # w3 is a (H2, 1) f32 column; result is the lane-dense (1, tb) output slab.
    q = jnp.sum(h2 * w3_ref[...], axis=0, keepdims=True)
    o_ref[...] = jnp.tanh(q).astype(o_ref.dtype)


def _round_up(x, m):
    return ((x + m - 1) // m) * m


def _num_tensorcores():
    """2 on v7x (two TensorCores per chip), else 1. Best-effort detection."""
    try:
        kind = (getattr(jax.devices()[0], "device_kind", "") or "").lower()
        if "v7" in kind or "7x" in kind:
            return 2
    except Exception:
        pass
    return 1


def _critic_forward_impl(state, action, w1s_t, w1a_t, w2_t, w3_col,
                         *, compute_dtype=jnp.float32, block_b=None):
    """state: (B, S), action: (B, A).
    Weights are kept in PyTorch (out, in) layout: w1s_t (H1, S), w1a_t (H1, A),
    w2_t (H2, H1), w3_col (H2, 1).  Returns (B, 1) like the PyTorch module."""
    B, S = state.shape
    A = action.shape[1]
    H1 = w1s_t.shape[0]
    H2 = w2_t.shape[0]

    # Generation-aware batch tiling; batch lives on the lane axis.
    b_min = _round_up(B, 128)
    if block_b is not None:
        tb = _round_up(int(block_b), 128)
    else:
        tb = _round_up(pl.cdiv(b_min, _num_tensorcores()), 128)
        tb = min(tb, 8192)                  # far below VMEM on v5e/v6e/v7x
    grid_b = pl.cdiv(b_min, tb)
    b_pad = grid_b * tb

    cd = jnp.dtype(compute_dtype)

    # Transpose to batch-on-lanes, cast once, pad only if actually needed.
    sT = state.T.astype(cd)
    aT = action.T.astype(cd)
    if b_pad != B:
        sT = jnp.pad(sT, ((0, 0), (0, b_pad - B)))
        aT = jnp.pad(aT, ((0, 0), (0, b_pad - B)))

    w1s_c = w1s_t.astype(cd)
    w1a_c = w1a_t.astype(cd)
    w2_c = w2_t.astype(cd)
    w3_f32 = w3_col.astype(jnp.float32)     # tiny; keep the reduction in f32

    out = pl.pallas_call(
        _critic_kernel,
        out_shape=jax.ShapeDtypeStruct((1, b_pad), jnp.float32),
        grid=(grid_b,),
        in_specs=[
            pl.BlockSpec((S, tb), lambda i: (0, i)),     # state^T tile
            pl.BlockSpec((A, tb), lambda i: (0, i)),     # action^T tile
            pl.BlockSpec((H1, S), lambda i: (0, 0)),     # weights: constant blocks
            pl.BlockSpec((H1, A), lambda i: (0, 0)),     #   -> VMEM-resident
            pl.BlockSpec((H2, H1), lambda i: (0, 0)),
            pl.BlockSpec((H2, 1), lambda i: (0, 0)),
        ],
        out_specs=pl.BlockSpec((1, tb), lambda i: (0, i)),
        compiler_params=pltpu.CompilerParams(
            dimension_semantics=("parallel",)),          # both TCs on v7x
    )(sT, aT, w1s_c, w1a_c, w2_c, w3_f32)

    # Lane-dense (1, b_pad) slab -> (B, 1) to match the PyTorch output shape.
    return out[0, :B][:, None]


critic_forward = jax.jit(_critic_forward_impl,
                         static_argnames=("compute_dtype", "block_b"))


def init_critic_params(key, state_dim, action_dim, h1, h2):
    """Uniform(-3e-4, 3e-4) init, matching weights_init_uniform.
    Weights kept in PyTorch (out, in) layout; W1 split by column blocks."""
    k1, k2, k3 = jax.random.split(key, 3)
    u = lambda k, shape: jax.random.uniform(
        k, shape, dtype=jnp.float32, minval=-0.0003, maxval=0.0003)
    w1 = u(k1, (h1, state_dim + action_dim))             # (H1, S+A)
    w1s_t, w1a_t = w1[:, :state_dim], w1[:, state_dim:]  # (H1,S), (H1,A)
    w2_t = u(k2, (h2, h1))                                # (H2, H1)
    w3_col = u(k3, (h2, 1))                               # (H2, 1)
    return w1s_t, w1a_t, w2_t, w3_col


def critic_reference(state, action, w1s_t, w1a_t, w2_t, w3_col,
                     compute_dtype=jnp.float32):
    """Pure-JAX reference (PyTorch-faithful when compute_dtype=f32)."""
    hp = jax.lax.Precision.HIGHEST
    cd = jnp.dtype(compute_dtype)
    x = jnp.concatenate([state, action], axis=1).astype(cd)
    w1 = jnp.concatenate([w1s_t, w1a_t], axis=1).astype(cd)      # (H1, S+A)
    h = jnp.maximum(jnp.dot(x, w1.T, preferred_element_type=jnp.float32,
                            precision=hp), 0.0)
    h = jnp.maximum(jnp.dot(h.astype(cd), w2_t.astype(cd).T,
                            preferred_element_type=jnp.float32,
                            precision=hp), 0.0)
    q = jnp.dot(h, w3_col.astype(jnp.float32),
                preferred_element_type=jnp.float32, precision=hp)
    return jnp.tanh(q)


if __name__ == "__main__":
    key = jax.random.PRNGKey(0)
    k_state, k_action, k_params = jax.random.split(key, 3)

    state_dim, action_dim = 8, 4
    hidden_one, hidden_two = 32, 32
    batch_big = 256  # two lane-dense 128-wide tiles on v7x, one tile otherwise

    state = jax.random.normal(k_state, (batch_big, state_dim), dtype=jnp.float32)
    action = jax.random.normal(k_action, (batch_big, action_dim), dtype=jnp.float32)
    params = init_critic_params(k_params, state_dim, action_dim,
                                hidden_one, hidden_two)

    # 1) Module-faithful small example (B=2, +-3e-4 init) — exercises padding.
    q2 = jax.block_until_ready(critic_forward(state[:2], action[:2], *params))
    q2_ref = critic_reference(state[:2], action[:2], *params)
    assert q2.shape == (2, 1)
    np.testing.assert_allclose(np.asarray(q2), np.asarray(q2_ref),
                               rtol=1e-4, atol=1e-6)

    # 2) Larger, numerically "hot" f32 check (scaled weights so tolerances bind).
    big = tuple(p * 1000.0 for p in params)
    qb = jax.block_until_ready(critic_forward(state, action, *big))
    qb_ref = critic_reference(state, action, *big)
    assert qb.shape == (batch_big, 1)
    np.testing.assert_allclose(np.asarray(qb), np.asarray(qb_ref),
                               rtol=1e-4, atol=1e-5)

    # 3) Opt-in bf16 matmul path (v6e/v7x) vs bf16-input / f32-accum reference.
    qbf = jax.block_until_ready(
        critic_forward(state, action, *big, compute_dtype=jnp.bfloat16))
    qbf_ref = critic_reference(state, action, *big,
                               compute_dtype=jnp.bfloat16)
    np.testing.assert_allclose(np.asarray(qbf), np.asarray(qbf_ref),
                               rtol=2e-2, atol=1e-3)

    print("KERNEL_OK")
</pallas_src>

<mosaic_0001>
module attributes {stable_mosaic.version = 11 : i64} {
  func.func @_critic_kernel(%arg0: i32, %arg1: memref<8x128xf32, #tpu.memory_space<vmem>>, %arg2: memref<4x128xf32, #tpu.memory_space<vmem>>, %arg3: memref<32x8xf32, #tpu.memory_space<vmem>>, %arg4: memref<32x4xf32, #tpu.memory_space<vmem>>, %arg5: memref<32x32xf32, #tpu.memory_space<vmem>>, %arg6: memref<32x1xf32, #tpu.memory_space<vmem>>, %arg7: memref<1x128xf32, #tpu.memory_space<vmem>>) attributes {dimension_semantics = [#tpu.dimension_semantics<parallel>], iteration_bounds = array<i64: 1>, scalar_prefetch = 0 : i64, scratch_operands = 0 : i64, tpu.core_type = #tpu.core_type<tc>, window_params = [{transform_indices = @transform_0, window_bounds = array<i64: 8, 128>}, {transform_indices = @transform_1, window_bounds = array<i64: 4, 128>}, {pipeline_mode = #tpu.pipeline_mode<synchronous>, transform_indices = @transform_2, window_bounds = array<i64: 32, 8>}, {pipeline_mode = #tpu.pipeline_mode<synchronous>, transform_indices = @transform_3, window_bounds = array<i64: 32, 4>}, {pipeline_mode = #tpu.pipeline_mode<synchronous>, transform_indices = @transform_4, window_bounds = array<i64: 32, 32>}, {pipeline_mode = #tpu.pipeline_mode<synchronous>, transform_indices = @transform_5, window_bounds = array<i64: 32, 1>}, {transform_indices = @transform_6, window_bounds = array<i64: 1, 128>}]} {
    %c0 = arith.constant 0 : index
    %c0_0 = arith.constant 0 : index
    %0 = vector.load %arg3[%c0, %c0_0] : memref<32x8xf32, #tpu.memory_space<vmem>>, vector<32x8xf32>
    %c0_1 = arith.constant 0 : index
    %c0_2 = arith.constant 0 : index
    %1 = vector.load %arg1[%c0_1, %c0_2] : memref<8x128xf32, #tpu.memory_space<vmem>>, vector<8x128xf32>
    %cst = arith.constant dense<0.000000e+00> : vector<32x128xf32>
    %2 = tpu.matmul %0, %1, %cst {dimension_numbers = #tpu.dot_dimension_numbers<[1], [0], [0], [1], [0, 0, 1, 1], [], []>} : vector<32x8xf32>, vector<8x128xf32>, vector<32x128xf32> -> vector<32x128xf32>
    %c0_3 = arith.constant 0 : index
    %c0_4 = arith.constant 0 : index
    %3 = vector.load %arg4[%c0_3, %c0_4] : memref<32x4xf32, #tpu.memory_space<vmem>>, vector<32x4xf32>
    %c0_5 = arith.constant 0 : index
    %c0_6 = arith.constant 0 : index
    %4 = vector.load %arg2[%c0_5, %c0_6] : memref<4x128xf32, #tpu.memory_space<vmem>>, vector<4x128xf32>
    %cst_7 = arith.constant dense<0.000000e+00> : vector<32x128xf32>
    %5 = tpu.matmul %3, %4, %cst_7 {dimension_numbers = #tpu.dot_dimension_numbers<[1], [0], [0], [1], [0, 0, 1, 1], [], []>} : vector<32x4xf32>, vector<4x128xf32>, vector<32x128xf32> -> vector<32x128xf32>
    %6 = arith.addf %2, %5 : vector<32x128xf32>
    %cst_8 = arith.constant 0.000000e+00 : f32
    %7 = vector.broadcast %cst_8 : f32 to vector<32x128xf32>
    %8 = arith.maximumf %6, %7 : vector<32x128xf32>
    %c0_9 = arith.constant 0 : index
    %c0_10 = arith.constant 0 : index
    %9 = vector.load %arg5[%c0_9, %c0_10] : memref<32x32xf32, #tpu.memory_space<vmem>>, vector<32x32xf32>
    %cst_11 = arith.constant dense<0.000000e+00> : vector<32x128xf32>
    %10 = tpu.matmul %9, %8, %cst_11 {dimension_numbers = #tpu.dot_dimension_numbers<[1], [0], [0], [1], [0, 0, 1, 1], [], []>} : vector<32x32xf32>, vector<32x128xf32>, vector<32x128xf32> -> vector<32x128xf32>
    %cst_12 = arith.constant 0.000000e+00 : f32
    %11 = vector.broadcast %cst_12 : f32 to vector<32x128xf32>
    %12 = arith.maximumf %10, %11 : vector<32x128xf32>
    %c0_13 = arith.constant 0 : index
    %c0_14 = arith.constant 0 : index
    %13 = vector.load %arg6[%c0_13, %c0_14] : memref<32x1xf32, #tpu.memory_space<vmem>>, vector<32x1xf32>
    %14 = vector.broadcast %13 : vector<32x1xf32> to vector<32x128xf32>
    %15 = arith.mulf %12, %14 : vector<32x128xf32>
    %cst_15 = arith.constant dense<0.000000e+00> : vector<128xf32>
    %16 = vector.multi_reduction <add>, %15, %cst_15 [0] : vector<32x128xf32> to vector<128xf32>
    %17 = vector.shape_cast %16 : vector<128xf32> to vector<1x128xf32>
    %18 = math.tanh %17 : vector<1x128xf32>
    %c0_16 = arith.constant 0 : index
    %c0_17 = arith.constant 0 : index
    %19 = vector.load %arg7[%c0_16, %c0_17] : memref<1x128xf32, #tpu.memory_space<vmem>>, vector<1x128xf32>
    tpu.vector_store %arg7[%c0_16, %c0_17], %18 {strides = array<i32>} : memref<1x128xf32, #tpu.memory_space<vmem>>, vector<1x128xf32>,
    return
  }
  func.func @transform_0(%arg0: i32) -> (i32, i32) {
    %c0_i32 = arith.constant 0 : i32
    %c0_i32_0 = arith.constant 0 : i32
    return %c0_i32, %arg0 : i32, i32
  }
  func.func @transform_1(%arg0: i32) -> (i32, i32) {
    %c0_i32 = arith.constant 0 : i32
    %c0_i32_0 = arith.constant 0 : i32
    return %c0_i32, %arg0 : i32, i32
  }
  func.func @transform_2(%arg0: i32) -> (i32, i32) {
    %c0_i32 = arith.constant 0 : i32
    %c0_i32_0 = arith.constant 0 : i32
    %c0_i32_1 = arith.constant 0 : i32
    return %c0_i32, %c0_i32_0 : i32, i32
  }
  func.func @transform_3(%arg0: i32) -> (i32, i32) {
    %c0_i32 = arith.constant 0 : i32
    %c0_i32_0 = arith.constant 0 : i32
    %c0_i32_1 = arith.constant 0 : i32
    return %c0_i32, %c0_i32_0 : i32, i32
  }
  func.func @transform_4(%arg0: i32) -> (i32, i32) {
    %c0_i32 = arith.constant 0 : i32
    %c0_i32_0 = arith.constant 0 : i32
    %c0_i32_1 = arith.constant 0 : i32
    return %c0_i32, %c0_i32_0 : i32, i32
  }
  func.func @transform_5(%arg0: i32) -> (i32, i32) {
    %c0_i32 = arith.constant 0 : i32
    %c0_i32_0 = arith.constant 0 : i32
    %c0_i32_1 = arith.constant 0 : i32
    return %c0_i32, %c0_i32_0 : i32, i32
  }
  func.func @transform_6(%arg0: i32) -> (i32, i32) {
    %c0_i32 = arith.constant 0 : i32
    %c0_i32_0 = arith.constant 0 : i32
    return %c0_i32, %arg0 : i32, i32
  }
}

</mosaic_0001>

<bundles_post_ra>
// kernel: _critic_forward_impl.1
= control target key start
LH: loop header
LB: loop body
LE: loop exit
PB: predicated region body
PF: predicated region fallthrough
CT: control target
= control target key end

     0   :  { %vm46_vm0 = vcmask 1043456   ;;  %vm33_vm1 = vcmask 31744   ;;  %vm135_vm2 = vcmask 64512   ;;  %vm241_vm3 = vcmask 261120   ;;  %s565_s1 = inlined_call_operand.vmem [shape: f32[4,128], index: 1, kind: input, shape index: {}]   ;;  %s566_s3 = inlined_call_operand.vmem [shape: f32[32,4], index: 3, kind: input, shape index: {}]   ;;  %s567_s0 = inlined_call_operand.vmem [shape: f32[8,128], index: 0, kind: input, shape index: {}]   ;;  %s568_s2 = inlined_call_operand.vmem [shape: f32[32,8], index: 2, kind: input, shape index: {}]   ;;  %s569_s4 = inlined_call_operand.vmem [shape: f32[32,32], index: 4, kind: input, shape index: {}]   ;;  %s570_s5 = inlined_call_operand.vmem [shape: f32[32,1], index: 5, kind: input, shape index: {}]   ;;  %s571_s6 = inlined_call_operand.vmem [shape: f32[1,128], index: 6, kind: output, shape index: {}]  }
   0x1   :  { %v32_v0 = vld [vmem:[%s565_s1] sm:$0xf]  ;;  %v29_v2 = vld [vmem:[%s566_s3 + $0x8] sm:$0xff]  ;;  %v30_v4 = vld [vmem:[%s566_s3 + $0x10] sm:$0xff]  ;;  %v464_v11 = vmov 0  }
   0x2   :  { %v28_v1 = vld [vmem:[%s566_s3] sm:$0xff]  ;;  %417 = vmatprep.subr.msk.mxu0 %vm46_vm0, %v32_v0  ;;  %v31_v5 = vld [vmem:[%s566_s3 + $0x18] sm:$0xff]  ;;  %v24_v7 = vld [vmem:[%s568_s2 + $0x8] sm:$0xff]  ;;  %460 = vset.pattern.permute.xlu0 %v464_v11 }
   0x3   :  { %419 = vmatprep.mubr.msk.f32.mxu0 %vm33_vm1, %v28_v1  ;;  %v27_v3 = vld [vmem:[%s567_s0] sm:$0xff]  ;;  %418 = vmatpush3.msk.msra.mxu0 %vm46_vm0, %v32_v0  ;;  %v25_v8 = vld [vmem:[%s568_s2 + $0x10] sm:$0xff]  ;;  %v26_v9 = vld [vmem:[%s568_s2 + $0x18] sm:$0xff] }
   0x4   :  { %420 = vmatmul.mubr.msk.f32.vlgmr.msra.gmra.mrb[0].mxu0 %vm33_vm1, %v29_v2  ;;  %425 = vmatprep.subr.mxu0 %v27_v3  ;;  %v23_v6 = vld [vmem:[%s568_s2] sm:$0xff]  ;;  %v345_v13 = vld [vmem:[%s570_s5 + $0x10] sm:$0xff]  ;;  %v344_v14 = vld [vmem:[%s570_s5 + $0x8] sm:$0xff] }
   0x5   :  { %426 = vmatpush3.msra.mxu0 %v27_v3  ;;  %422 = vmatprep.mubr.msk.f32.mxu0 %vm33_vm1, %v30_v4  ;;  %v237_v10 = vld [vmem:[%s569_s4] sm:$0xff]  ;;  %v346_v15 = vld [vmem:[%s570_s5 + $0x18] sm:$0xff]  ;;  %v238_v26 = vld [vmem:[%s569_s4 + $0x8] sm:$0xff] }
   0x6   :  { %441 = vmatprep.mubr.msk.f32.mxu1 %vm241_vm3, %v237_v10  ;;  %v343_v12 = vld [vmem:[%s570_s5] sm:$0xff]  ;;  %461 = vset.pattern.permute.xlu1 %v464_v11  ;;  %v239_v27 = vld [vmem:[%s569_s4 + $0x10] sm:$0xff]  ;;  %v240_v28 = vld [vmem:[%s569_s4 + $0x18] sm:$0xff] }
   0x7   :  { %349 = vperm.xlu0 %460, %v343_v12   ;;  %359 = vperm.xlu1 %461, %v345_v13  }
   0x8   :  { %423 = vmatmul.mubr.msk.f32.gmra.mrb[2].mxu0 %vm33_vm1, %v31_v5 }
   0x9   :  { %427 = vmatprep.mubr.msk.f32.mxu0 %vm135_vm2, %v23_v6 }
   0xb   :  { %354 = vperm.xlu0 %460, %v344_v14   ;;  %364 = vperm.xlu1 %461, %v346_v15  }
   0xc   :  { %428 = vmatmul.mubr.msk.f32.vlgmr.msra.gmra.mrb[0].mxu0 %vm135_vm2, %v24_v7 }
   0xd   :  { %430 = vmatprep.mubr.msk.f32.mxu0 %vm135_vm2, %v25_v8 }
  0x10   :  { %431 = vmatmul.mubr.msk.f32.gmra.mrb[2].mxu0 %vm135_vm2, %v26_v9 }
  0x86   :  { %v350_v29 = vpop.permute.xlu0 %349  ;;  %v360_v34 = vpop.permute.xlu1 %359 }
  0x8a   :  { %v355_v31 = vpop.permute.xlu0 %354  ;;  %v365_v43 = vpop.permute.xlu1 %364 }
  0xdf   :  { %v429_v16 = vpop.f32.mrb[0].mxu0 }
  0xe0   :  { %v234_v17 = vmax.f32 %v429_v16, 0.0  ;;  %v214_v18 = vpop.f32.mrb[1].mxu0 }
  0xe1   :  { %v233_v19 = vmax.f32 %v214_v18, 0.0 }
  0xe3   :  { %v432_v20 = vpop.f32.mrb[2].mxu0  ;;  %v447_v21 = vpack.c.bf16 %v234_v17, %v233_v19 }
  0xe4   :  { %v236_v22 = vmax.f32 %v432_v20, 0.0  ;;  %v224_v23 = vpop.f32.mrb[3].mxu0 }
  0xe5   :  { %v235_v24 = vmax.f32 %v224_v23, 0.0  ;;  %448 = vmatprep.subr.bf16.mxu1 %v447_v21 }
  0xe6   :  { %450 = vmatpush3.bf16.msra.mxu1 %v447_v21 }
  0xe7   :  { %v451_v25 = vpack.c.bf16 %v236_v22, %v235_v24 }
  0xe9   :  { %452 = vmatprep.subr.bf16.mxu1 %v451_v25 }
  0xea   :  { %454 = vmatpush3.bf16.msra.mxu1 %v451_v25 }
  0xed   :  { %442 = vmatmul.mubr.msk.f32.vlgmr.msra.gmra.mrb[0].mxu1 %vm241_vm3, %v238_v26 }
  0xee   :  { %444 = vmatprep.mubr.msk.f32.mxu1 %vm241_vm3, %v239_v27 }
  0xf1   :  { %445 = vmatmul.mubr.msk.f32.gmra.mrb[2].mxu1 %vm241_vm3, %v240_v28 }
 0x1c0   :  { %v443_v30 = vpop.f32.mrb[0].mxu1 }
 0x1c1   :  { %v340_v32 = vmax.f32 %v443_v30, 0.0  ;;  %v320_v33 = vpop.f32.mrb[1].mxu1 }
 0x1c2   :  { %v339_v35 = vmax.f32 %v320_v33, 0.0 }
 0x1c3   :  { %v368_v36 = vmul.f32 %v355_v31, %v340_v32 }
 0x1c4   :  { %v367_v37 = vmul.f32 %v350_v29, %v339_v35  ;;  %v446_v38 = vpop.f32.mrb[2].mxu1 }
 0x1c5   :  { %v330_v39 = vpop.f32.mrb[3].mxu1  ;;  %v342_v41 = vmax.f32 %v446_v38, 0.0 }
 0x1c6   :  { %v371_v40 = vadd.f32 %v368_v36, %v367_v37  ;;  %v341_v42 = vmax.f32 %v330_v39, 0.0 }
 0x1c7   :  { %v370_v46 = vmul.f32 %v365_v43, %v342_v41 }
 0x1c8   :  { %v369_v44 = vmul.f32 %v360_v34, %v341_v42 }
 0x1ca   :  { %v372_v45 = vadd.f32 %v371_v40, %v369_v44 }
 0x1cc   :  { %v373_v47 = vadd.f32 %v372_v45, %v370_v46 }
 0x1ce   :  { %v374_v48 = vrot.slane %v373_v47, 4 }
 0x1d0   :  { %v375_v49 = vadd.f32 %v374_v48, %v373_v47 }
 0x1d2   :  { %v376_v50 = vrot.slane %v375_v49, 2 }
 0x1d4   :  { %v377_v51 = vadd.f32 %v376_v50, %v375_v49 }
 0x1d6   :  { %v378_v52 = vrot.slane %v377_v51, 1 }
 0x1d8   :  { %v379_v53 = vadd.f32 %v378_v52, %v377_v51 }
 0x1da   :  { %462 = vtanh.f32 %v379_v53 }
 0x1e4   :  { %v463_v54 = vpop.eup %462 }
 0x1e5   :  { %381 = vst [vmem:[%s571_s6] sm:$0x1] %v463_v54 }

</bundles_post_ra>
